<compile_context>
chip_gen: v7x
topology: tpu7x:2x2x1
jax: 0.10.0
libtpu: 0.0.40
codegen_flags: <defaults>
</compile_context>

<pallas_src>
import functools

import jax
import jax.numpy as jnp
import numpy as np
from jax.experimental import pallas as pl
from jax.experimental.pallas import tpu as pltpu


def mlp_kernel(x_ref, w1_ref, b1_ref, w2_ref, b2_ref, w3_ref, b3_ref, o_ref,
               *, use_bf16_matmul):
    # x_ref: (1, tile_n)   w1/b1/b2/w3: (H, 1)   w2: (H, H)   b3: (1,) in SMEM
    x = x_ref[...]                                            # (1, tile_n)

    # NOTE(ragged tail): the last grid block may hold unspecified data in its
    # out-of-range lanes.  Every stage below is lane-independent (fc1/fc3 are
    # per-lane, fc2 contracts over sublanes only), so garbage lanes stay
    # garbage and Pallas drops their output writes.  Do NOT add any cross-lane
    # reduction here without restoring an explicit pad+mask.

    # fc1 + ReLU: K=1 outer product -> pure VPU broadcast.
    h1 = jnp.maximum(w1_ref[...] * x + b1_ref[...], 0.0)      # (H, tile_n)

    # fc2 + ReLU: lane-dense MXU matmul with f32 accumulation.
    w2 = w2_ref[...]
    if use_bf16_matmul:
        # Single-pass bf16 MXU on all generations; accumulator stays f32.
        w2 = w2.astype(jnp.bfloat16)
        h1 = h1.astype(jnp.bfloat16)
    h2 = jnp.dot(w2, h1, preferred_element_type=jnp.float32)
    h2 = jnp.maximum(h2 + b2_ref[...], 0.0)                   # (H, tile_n)

    # fc3: 1-wide output -> VPU multiply + XLU sublane reduce + scalar bias.
    y = jnp.sum(w3_ref[...] * h2, axis=0, keepdims=True) + b3_ref[0]  # (1, tile_n)

    o_ref[...] = y.astype(o_ref.dtype)


def _pick_tile_n(N):
    # Big lane tiles amortize per-grid-step overhead; for small N prefer >=2
    # steps so v7x's two TensorCores both get work on the "parallel" axis.
    if N <= 256:
        return 128
    if N <= 4096:
        half = pl.cdiv(N, 2)
        return min(2048, 128 * pl.cdiv(half, 128))   # N=1000 -> 512 (2 steps)
    return 4096  # (64, 4096) f32 intermediates = 1 MiB: trivially fits VMEM


def net_forward(x, params, *, tile_n=None, use_bf16_matmul=False):
    """x: (N, 1) float32 (same as the PyTorch module). Returns (N, 1)."""
    w1, b1, w2, b2, w3, b3 = params  # (H,1),(H,1),(H,H),(H,1),(H,1),(1,1)
    N = x.shape[0]
    H = w1.shape[0]

    if tile_n is None:
        tile_n = _pick_tile_n(N)
    n_tiles = pl.cdiv(N, tile_n)

    xt = x.reshape(1, N)          # free reshape: batch onto the lane axis
    b3s = b3.reshape((1,))        # scalar bias -> 1-D SMEM operand

    kernel = functools.partial(mlp_kernel, use_bf16_matmul=use_bf16_matmul)

    # Constant-index parameter blocks: single-buffered (index never changes).
    def param_spec(shape):
        return pl.BlockSpec(shape, lambda i: (0, 0), pipeline_mode=pl.Buffered(1))

    out = pl.pallas_call(
        kernel,
        out_shape=jax.ShapeDtypeStruct((1, N), x.dtype),
        grid_spec=pltpu.PrefetchScalarGridSpec(
            num_scalar_prefetch=0,
            grid=(n_tiles,),
            in_specs=[
                pl.BlockSpec((1, tile_n), lambda i: (0, i)),      # x (lane-dense)
                param_spec((H, 1)),                               # w1
                param_spec((H, 1)),                               # b1
                param_spec((H, H)),                               # w2
                param_spec((H, 1)),                               # b2
                param_spec((H, 1)),                               # w3 (stored (H,1))
                pl.BlockSpec(memory_space=pltpu.MemorySpace.SMEM),  # b3 scalar
            ],
            out_specs=pl.BlockSpec((1, tile_n), lambda i: (0, i)),  # lane-dense out
        ),
        compiler_params=pltpu.CompilerParams(
            dimension_semantics=("parallel",),  # shards lane tiles across TCs on v7x
        ),
    )(xt, w1, b1, w2, b2, w3, b3s)

    return out.reshape(N, 1)      # free reshape, no slicing


def init_params(key, hidden_size):
    # nn.Linear-style uniform(-1/sqrt(fan_in), 1/sqrt(fan_in)); weights stored
    # as (out_features, in_features) to match the transposed (lane = batch) layout.
    k1, k2, k3, k4, k5, k6 = jax.random.split(key, 6)

    def lin(kw, kb, fan_in, fan_out):
        bound = 1.0 / np.sqrt(fan_in)
        w = jax.random.uniform(kw, (fan_out, fan_in), jnp.float32, -bound, bound)
        b = jax.random.uniform(kb, (fan_out, 1), jnp.float32, -bound, bound)
        return w, b

    w1, b1 = lin(k1, k2, 1, hidden_size)              # (H,1), (H,1)
    w2, b2 = lin(k3, k4, hidden_size, hidden_size)    # (H,H), (H,1)
    w3, b3 = lin(k5, k6, hidden_size, 1)              # (1,H), (1,1)
    w3 = w3.T                                         # store as (H,1) column
    b3 = b3.reshape(1, 1)
    return (w1, b1, w2, b2, w3, b3)


def reference_forward(x, params):
    w1, b1, w2, b2, w3, b3 = params
    h = jnp.maximum(x @ w1.T + b1.T, 0.0)
    h = jnp.maximum(h @ w2.T + b2.T, 0.0)
    return h @ w3 + b3


if __name__ == "__main__":
    hidden_size = 64      # PyTorch module default
    N = 1000              # torch.linspace(-5, 5, 1000).view(-1, 1)

    key = jax.random.PRNGKey(0)
    params = init_params(key, hidden_size)

    x = jnp.linspace(-5.0, 5.0, N, dtype=jnp.float32).reshape(-1, 1)

    out = net_forward(x, params)          # N=1000 -> tile_n=512, 2 grid steps
    out = jax.block_until_ready(out)

    ref = reference_forward(x, params)
    assert out.shape == (N, 1)
    np.testing.assert_allclose(np.asarray(out), np.asarray(ref), rtol=1e-4, atol=1e-5)

    print("KERNEL_OK")
</pallas_src>

<mosaic_0001>
module attributes {stable_mosaic.version = 11 : i64} {
  func.func @mlp_kernel(%arg0: i32, %arg1: memref<1x512xf32, #tpu.memory_space<vmem>>, %arg2: memref<64x1xf32, #tpu.memory_space<vmem>>, %arg3: memref<64x1xf32, #tpu.memory_space<vmem>>, %arg4: memref<64x64xf32, #tpu.memory_space<vmem>>, %arg5: memref<64x1xf32, #tpu.memory_space<vmem>>, %arg6: memref<64x1xf32, #tpu.memory_space<vmem>>, %arg7: memref<1xf32, #tpu.memory_space<smem>>, %arg8: memref<1x512xf32, #tpu.memory_space<vmem>>) attributes {dimension_semantics = [#tpu.dimension_semantics<parallel>], iteration_bounds = array<i64: 2>, scalar_prefetch = 0 : i64, scratch_operands = 0 : i64, tpu.core_type = #tpu.core_type<tc>, window_params = [{transform_indices = @transform_0, window_bounds = array<i64: 1, 512>}, {pipeline_mode = #tpu.pipeline_mode<synchronous>, transform_indices = @transform_1, window_bounds = array<i64: 64, 1>}, {pipeline_mode = #tpu.pipeline_mode<synchronous>, transform_indices = @transform_2, window_bounds = array<i64: 64, 1>}, {pipeline_mode = #tpu.pipeline_mode<synchronous>, transform_indices = @transform_3, window_bounds = array<i64: 64, 64>}, {pipeline_mode = #tpu.pipeline_mode<synchronous>, transform_indices = @transform_4, window_bounds = array<i64: 64, 1>}, {pipeline_mode = #tpu.pipeline_mode<synchronous>, transform_indices = @transform_5, window_bounds = array<i64: 64, 1>}, {transform_indices = @transform_6, window_bounds = array<i64: 1>}, {transform_indices = @transform_7, window_bounds = array<i64: 1, 512>}]} {
    %c0 = arith.constant 0 : index
    %c0_0 = arith.constant 0 : index
    %0 = vector.load %arg1[%c0, %c0_0] : memref<1x512xf32, #tpu.memory_space<vmem>>, vector<1x512xf32>
    %c0_1 = arith.constant 0 : index
    %c0_2 = arith.constant 0 : index
    %1 = vector.load %arg2[%c0_1, %c0_2] : memref<64x1xf32, #tpu.memory_space<vmem>>, vector<64x1xf32>
    %2 = vector.broadcast %1 : vector<64x1xf32> to vector<64x512xf32>
    %3 = vector.broadcast %0 : vector<1x512xf32> to vector<64x512xf32>
    %4 = arith.mulf %2, %3 : vector<64x512xf32>
    %c0_3 = arith.constant 0 : index
    %c0_4 = arith.constant 0 : index
    %5 = vector.load %arg3[%c0_3, %c0_4] : memref<64x1xf32, #tpu.memory_space<vmem>>, vector<64x1xf32>
    %6 = vector.broadcast %5 : vector<64x1xf32> to vector<64x512xf32>
    %7 = arith.addf %4, %6 : vector<64x512xf32>
    %cst = arith.constant 0.000000e+00 : f32
    %8 = vector.broadcast %cst : f32 to vector<64x512xf32>
    %9 = arith.maximumf %7, %8 : vector<64x512xf32>
    %c0_5 = arith.constant 0 : index
    %c0_6 = arith.constant 0 : index
    %10 = vector.load %arg4[%c0_5, %c0_6] : memref<64x64xf32, #tpu.memory_space<vmem>>, vector<64x64xf32>
    %cst_7 = arith.constant dense<0.000000e+00> : vector<64x512xf32>
    %11 = tpu.matmul %10, %9, %cst_7 {dimension_numbers = #tpu.dot_dimension_numbers<[1], [0], [0], [1], [0, 0, 1, 1], [], []>} : vector<64x64xf32>, vector<64x512xf32>, vector<64x512xf32> -> vector<64x512xf32>
    %c0_8 = arith.constant 0 : index
    %c0_9 = arith.constant 0 : index
    %12 = vector.load %arg5[%c0_8, %c0_9] : memref<64x1xf32, #tpu.memory_space<vmem>>, vector<64x1xf32>
    %13 = vector.broadcast %12 : vector<64x1xf32> to vector<64x512xf32>
    %14 = arith.addf %11, %13 : vector<64x512xf32>
    %cst_10 = arith.constant 0.000000e+00 : f32
    %15 = vector.broadcast %cst_10 : f32 to vector<64x512xf32>
    %16 = arith.maximumf %14, %15 : vector<64x512xf32>
    %c0_11 = arith.constant 0 : index
    %c0_12 = arith.constant 0 : index
    %17 = vector.load %arg6[%c0_11, %c0_12] : memref<64x1xf32, #tpu.memory_space<vmem>>, vector<64x1xf32>
    %18 = vector.broadcast %17 : vector<64x1xf32> to vector<64x512xf32>
    %19 = arith.mulf %18, %16 : vector<64x512xf32>
    %cst_13 = arith.constant dense<0.000000e+00> : vector<512xf32>
    %20 = vector.multi_reduction <add>, %19, %cst_13 [0] : vector<64x512xf32> to vector<512xf32>
    %21 = vector.shape_cast %20 : vector<512xf32> to vector<1x512xf32>
    %c0_14 = arith.constant 0 : index
    %22 = memref.load %arg7[%c0_14] : memref<1xf32, #tpu.memory_space<smem>>
    %23 = vector.broadcast %22 : f32 to vector<1x512xf32>
    %24 = arith.addf %21, %23 : vector<1x512xf32>
    %c0_15 = arith.constant 0 : index
    %c0_16 = arith.constant 0 : index
    %25 = vector.load %arg8[%c0_15, %c0_16] : memref<1x512xf32, #tpu.memory_space<vmem>>, vector<1x512xf32>
    tpu.vector_store %arg8[%c0_15, %c0_16], %24 {strides = array<i32>} : memref<1x512xf32, #tpu.memory_space<vmem>>, vector<1x512xf32>,
    return
  }
  func.func @transform_0(%arg0: i32) -> (i32, i32) {
    %c0_i32 = arith.constant 0 : i32
    %c0_i32_0 = arith.constant 0 : i32
    return %c0_i32, %arg0 : i32, i32
  }
  func.func @transform_1(%arg0: i32) -> (i32, i32) {
    %c0_i32 = arith.constant 0 : i32
    %c0_i32_0 = arith.constant 0 : i32
    %c0_i32_1 = arith.constant 0 : i32
    return %c0_i32, %c0_i32_0 : i32, i32
  }
  func.func @transform_2(%arg0: i32) -> (i32, i32) {
    %c0_i32 = arith.constant 0 : i32
    %c0_i32_0 = arith.constant 0 : i32
    %c0_i32_1 = arith.constant 0 : i32
    return %c0_i32, %c0_i32_0 : i32, i32
  }
  func.func @transform_3(%arg0: i32) -> (i32, i32) {
    %c0_i32 = arith.constant 0 : i32
    %c0_i32_0 = arith.constant 0 : i32
    %c0_i32_1 = arith.constant 0 : i32
    return %c0_i32, %c0_i32_0 : i32, i32
  }
  func.func @transform_4(%arg0: i32) -> (i32, i32) {
    %c0_i32 = arith.constant 0 : i32
    %c0_i32_0 = arith.constant 0 : i32
    %c0_i32_1 = arith.constant 0 : i32
    return %c0_i32, %c0_i32_0 : i32, i32
  }
  func.func @transform_5(%arg0: i32) -> (i32, i32) {
    %c0_i32 = arith.constant 0 : i32
    %c0_i32_0 = arith.constant 0 : i32
    %c0_i32_1 = arith.constant 0 : i32
    return %c0_i32, %c0_i32_0 : i32, i32
  }
  func.func @transform_6(%arg0: i32) -> i32 {
    %c0_i32 = arith.constant 0 : i32
    %c0_i32_0 = arith.constant 0 : i32
    return %c0_i32 : i32
  }
  func.func @transform_7(%arg0: i32) -> (i32, i32) {
    %c0_i32 = arith.constant 0 : i32
    %c0_i32_0 = arith.constant 0 : i32
    return %c0_i32, %arg0 : i32, i32
  }
}

</mosaic_0001>

<bundles_post_ra>
// kernel: tpu_custom_call.1
= control target key start
LH: loop header
LB: loop body
LE: loop exit
PB: predicated region body
PF: predicated region fallthrough
CT: control target
= control target key end

     0   :  { %s1613_s0 = inlined_call_operand.vmem [shape: f32[1,1000], index: 0, kind: input, shape index: {}]   ;;  %s1614_s1 = inlined_call_operand.vmem [shape: f32[64,1], index: 1, kind: input, shape index: {}]   ;;  %s1615_s2 = inlined_call_operand.vmem [shape: f32[64,1], index: 2, kind: input, shape index: {}]   ;;  %s1616_s3 = inlined_call_operand.vmem [shape: f32[64,64], index: 3, kind: input, shape index: {}]   ;;  %s1617_s4 = inlined_call_operand.vmem [shape: f32[64,1], index: 4, kind: input, shape index: {}]   ;;  %s1618_s5 = inlined_call_operand.vmem [shape: f32[64,1], index: 5, kind: input, shape index: {}]   ;;  %s1619_s6 = inlined_call_operand.<no memory space> [shape: f32[1], index: 6, kind: input, shape index: {}]   ;;  %s1620_s7 = inlined_call_operand.hbm [shape: f32[1,1000], index: 7, kind: output, shape index: {}]  }
   0x1   :  { %12 = sst [smem:[#allocation2]] %s1619_s6 }
   0x2   :  { %13 = vsyncpa [#allocation4], 0 }
   0x3   :  { %15 = vsyncpa [#allocation4 + $0x1], 0  ;;  %s1289_s26 = smov 0   ;;  %s1291_s27 = smov 0  }
   0x4   :  { %s1293_s28 = smov 0   ;;  %s1295_s29 = smov 0  }
   0x5 LB: > { %s1310_s6 = sadd.s32 4294967295, %s1240_s29   ;;  %s1074_s30 = sadd.s32 4294967294, %s1240_s29   ;;  %s1240_s29 = sphi %s1295_s29, %s1626_s29   ;;  %s1236_s28 = sphi %s1293_s28, %s1625_s28   ;;  %s1232_s27 = sphi %s1291_s27, %s1624_s27   ;;  %s1228_s26 = sphi %s1289_s26, %s1623_s26  }
   0x6   : > { %s1314_s8 = sadd.s32 1, %s1240_s29   ;;  %s180_s9 = sadd.s32 1, %s1236_s28 }
   0x7   : > { %s177_s10 = ssub.s32 %s1240_s29, %s1314_s8  ;;  %p190_p0 = scmp.ne.s32.totalorder %s1236_s28, %s1232_s27 }
   0x8   : > { %p178_p1 = scmp.eq.s32.totalorder %s177_s10, 0  ;;  %p191_p2 = scmp.eq.s32.totalorder %s1310_s6, 1 }
   0x9   : > { %p196_p3 = scmp.ne.s32.totalorder %s1232_s27, %s1228_s26  ;;  %p197_p4 = scmp.eq.s32.totalorder %s1074_s30, 1 }
   0xa   : > { %s1325_s11 = scalar_select %p178_p1, %s1236_s28, %s180_s9  }
   0xb   : > { %p1327_p5 = por %p191_p2, %p190_p0  ;;  %p1331_p6 = por %p197_p4, %p196_p3 }
   0xc   : > { %p1077_p7 = scmp.ge.s32.totalorder %s1240_s29, 1  ;;  %p241_p8 = scmp.lt.s32.totalorder %s1240_s29, 3 }
   0xe   : > { %p242_p9 = pnand %p1077_p7, %p241_p8 }
   0xf   : > { %v380_v0 = vld [vmem:[%s1615_s2] sm:$0xff] (!%p242_p9)  ;;  %v1242_v2 = vmov (!%p242_p9), 0   ;;  %v381_v3 = vld [vmem:[%s1615_s2 + $0x8] sm:$0xff] (!%p242_p9)  ;;  %v282_v5 = vld [vmem:[%s1614_s1 + $0x18] sm:$0xff] (!%p242_p9)  ;;  %v1243_v23 = vmov (!%p242_p9), 0.0   ;;  %s1079_s18 = sshll.u32 (!%p242_p9), %s1310_s6, 2  ;;  %v328_v34 = vlaneseq (!%p242_p9) }
  0x10   : > { %245 = sbr.rel (%p242_p9) target bundleno = 469 (0x1d5), region = 48  ;;  %v279_v1 = vld [vmem:[%s1614_s1] sm:$0xff] (!%p242_p9)  ;;  %1177 = vset.pattern.permute.xlu1 (!%p242_p9), %v1242_v2  ;;  %1176 = vset.pattern.permute.xlu0 (!%p242_p9), %v1242_v2  ;;  %v280_v4 = vld [vmem:[%s1614_s1 + $0x8] sm:$0xff] (!%p242_p9)  ;;  %v281_v6 = vld [vmem:[%s1614_s1 + $0x10] sm:$0xff] (!%p242_p9)  ;;  %p273_p10 = scmp.lt.s32.totalorder (!%p242_p9), %s1079_s18, 7  ;;  %vm548_vm0 = vcmask (!%p242_p9), 523264  }
  0x11   : > { %390 = vperm.xlu1 (!%p242_p9), %1177, %v380_v0   ;;  %289 = vperm.xlu0 (!%p242_p9), %1176, %v279_v1   ;;  %v383_v7 = vld [vmem:[%s1615_s2 + $0x18] sm:$0xff] (!%p242_p9)  ;;  %v382_v8 = vld [vmem:[%s1615_s2 + $0x10] sm:$0xff] (!%p242_p9)  ;;  %v284_v9 = vld [vmem:[%s1614_s1 + $0x28] sm:$0xff] (!%p242_p9)  ;;  %v1437_v35 = vshrl.u32 (!%p242_p9), %v328_v34, 7  ;;  %s963_s23 = sld [smem:[#allocation2]] (!%p242_p9)  ;;  %s269_s24 = sand.u32 (!%p242_p9), 1, %s1232_s27  }
  0x12   : > { %v283_v10 = vld [vmem:[%s1614_s1 + $0x20] sm:$0xff] (!%p242_p9)  ;;  %v385_v11 = vld [vmem:[%s1615_s2 + $0x28] sm:$0xff] (!%p242_p9)  ;;  %v286_v13 = vld [vmem:[%s1614_s1 + $0x38] sm:$0xff] (!%p242_p9)  ;;  %637 = vmatprep.mubr.f32.mxu0 (!%p242_p9), %v1243_v23  ;;  %750 = vmatprep.mubr.f32.mxu1 (!%p242_p9), %v1243_v23  ;;  %s1078_s25 = sshll.u32 (!%p242_p9), %s269_s24, 2  ;;  %s1101_s30 = sshll.u32 (!%p242_p9), %s1310_s6, 6  ;;  %vm1000_vm1 = vcmp.lt.s32.totalorder (!%p242_p9), %v328_v34, 512 }
  0x13   : > { %v384_v12 = vld [vmem:[%s1615_s2 + $0x20] sm:$0xff] (!%p242_p9)  ;;  %v285_v14 = vld [vmem:[%s1614_s1 + $0x30] sm:$0xff] (!%p242_p9)  ;;  %v387_v15 = vld [vmem:[%s1615_s2 + $0x38] sm:$0xff] (!%p242_p9)  ;;  %v330_v36 = vsub.s32 (!%p242_p9), 0, %v1437_v35  ;;  %v338_v37 = vsub.s32 (!%p242_p9), 2, %v1437_v35  ;;  %v334_v38 = vsub.s32 (!%p242_p9), 1, %v1437_v35  ;;  %s1571_s16 = scalar_lea.hbm (!%p242_p9), %s1620_s7, %s1101_s30 }
  0x14   : > { %v386_v16 = vld [vmem:[%s1615_s2 + $0x30] sm:$0xff] (!%p242_p9)  ;;  %v501_v17 = vld [vmem:[%s1617_s4 + $0x8] sm:$0xff] (!%p242_p9)  ;;  %v500_v18 = vld [vmem:[%s1617_s4] sm:$0xff] (!%p242_p9)  ;;  %v342_v39 = vsub.s32 (!%p242_p9), 3, %v1437_v35  ;;  %s271_s9 = scalar_lea.vmem (!%p242_p9), [#allocation3], %s1078_s25  ;;  %s1004_s17 = scalar_lea.sflag (!%p242_p9), [#allocation4], %s269_s24 }
  0x15   : > { %395 = vperm.xlu1 (!%p242_p9), %1177, %v381_v3   ;;  %294 = vperm.xlu0 (!%p242_p9), %1176, %v280_v4   ;;  %v503_v19 = vld [vmem:[%s1617_s4 + $0x18] sm:$0xff] (!%p242_p9)  ;;  %v502_v20 = vld [vmem:[%s1617_s4 + $0x10] sm:$0xff] (!%p242_p9)  ;;  %v832_v21 = vld [vmem:[%s1618_s5 + $0x8] sm:$0xff] (!%p242_p9)  ;;  %s1018_s10 = sshll.u32 (!%p242_p9), %s271_s9, 4  ;;  %s1245_s6 = smov (!%p242_p9), [#allocation3]   ;;  %s1573_s10 = int_to_ptr.vmem [resolvable:$true] %s1018_s10 }
  0x16   : > { %v831_v22 = vld [vmem:[%s1618_s5] sm:$0xff] (!%p242_p9)  ;;  %v833_v24 = vld [vmem:[%s1618_s5 + $0x10] sm:$0xff] (!%p242_p9)  ;;  %v834_v26 = vld [vmem:[%s1618_s5 + $0x18] sm:$0xff] (!%p242_p9)  ;;  %s1182_s19 = sshll.u32 (!%p242_p9), %s1245_s6, 4  ;;  %s1183_s19 = int_to_ptr.vmem [resolvable:$false] %s1182_s19 }
  0x17   : > { %v504_v25 = vld [vmem:[%s1617_s4 + $0x20] sm:$0xff]  ;;  %v505_v27 = vld [vmem:[%s1617_s4 + $0x28] sm:$0xff]  ;;  %v506_v29 = vld [vmem:[%s1617_s4 + $0x30] sm:$0xff]  ;;  %s1628_s18 = smov (!%p273_p10, %s1079_s18), 7  ;;  %s1184_s20 = scalar_lea.vmem %s1183_s19, 128 }
  0x18   : > { %v835_v28 = vld [vmem:[%s1618_s5 + $0x20] sm:$0xff]  ;;  %v836_v30 = vld [vmem:[%s1618_s5 + $0x28] sm:$0xff]  ;;  %v507_v31 = vld [vmem:[%s1617_s4 + $0x38] sm:$0xff]  ;;  %s275_s21 = scalar_lea.vmem %s1613_s0, %s1628_s18  ;;  %s1178_s18 = scalar_lea.vmem %s1573_s10, 64 }
  0x19   : > { %304 = vperm.xlu1 %1177, %v282_v5   ;;  %299 = vperm.xlu0 %1176, %v281_v6   ;;  %v838_v32 = vld [vmem:[%s1618_s5 + $0x38] sm:$0xff]  ;;  %v837_v33 = vld [vmem:[%s1618_s5 + $0x30] sm:$0xff]  ;;  %v278_v40 = vld [vmem:[%s275_s21] sm:$0xf]  ;;  %p1179_p11 = scmp.ne.s32.totalorder %s1573_s10, %s1178_s18  ;;  %p1185_p0 = scmp.lt.s32.totalorder %s1573_s10, %s1183_s19 }
  0x1a   : > { %v1446_v41 = vrot.slane %v278_v40, %v330_v36  ;;  %v1448_v42 = vrot.slane %v278_v40, %v338_v37  ;;  %v1450_v43 = vrot.slane %v278_v40, %v334_v38  ;;  %v1452_v44 = vrot.slane %v278_v40, %v342_v39  ;;  %p1186_p1 = scmp.lt.s32.totalorder %s1184_s20, %s1178_s18 }
  0x1b   : > { %p1180_p12 = pnand %p1179_p11, %p1327_p5 }
  0x1c   : > { %p1187_p2 = por %p1186_p1, %p1185_p0 }
  0x1d   : > { %405 = vperm.xlu1 %1177, %v383_v7   ;;  %400 = vperm.xlu0 %1176, %v382_v8   ;;  %p1181_p13 = pneg %p1180_p12 }
  0x1f   : > { %p1188_p3 = pnand %p1187_p2, %p1181_p13 }
  0x21   : > { %314 = vperm.xlu1 %1177, %v284_v9   ;;  %309 = vperm.xlu0 %1176, %v283_v10  }
  0x25   : > { %415 = vperm.xlu1 %1177, %v385_v11   ;;  %410 = vperm.xlu0 %1176, %v384_v12  }
  0x29   : > { %324 = vperm.xlu1 %1177, %v286_v13   ;;  %319 = vperm.xlu0 %1176, %v285_v14  }
  0x2d   : > { %425 = vperm.xlu1 %1177, %v387_v15   ;;  %420 = vperm.xlu0 %1176, %v386_v16  }
  0x31   : > { %515 = vperm.xlu1 %1177, %v501_v17   ;;  %510 = vperm.xlu0 %1176, %v500_v18  }
  0x35   : > { %525 = vperm.xlu1 %1177, %v503_v19   ;;  %520 = vperm.xlu0 %1176, %v502_v20  }
  0x39   : > { %846 = vperm.xlu1 %1177, %v832_v21   ;;  %841 = vperm.xlu0 %1176, %v831_v22  }
  0x3d   : > { %851 = vperm.xlu1 %1177, %v833_v24   ;;  %530 = vperm.xlu0 %1176, %v504_v25  }
  0x41   : > { %856 = vperm.xlu1 %1177, %v834_v26   ;;  %535 = vperm.xlu0 %1176, %v505_v27  }
  0x45   : > { %861 = vperm.xlu1 %1177, %v835_v28   ;;  %540 = vperm.xlu0 %1176, %v506_v29  }
  0x49   : > { %866 = vperm.xlu1 %1177, %v836_v30   ;;  %545 = vperm.xlu0 %1176, %v507_v31  }
  0x4d   : > { %876 = vperm.xlu1 %1177, %v838_v32   ;;  %871 = vperm.xlu0 %1176, %v837_v33  }
  0x90   : > { %v391_v45 = vpop.permute.xlu1 %390  ;;  %v290_v46 = vpop.permute.xlu0 %289 }
  0x91   : > { %v348_v47 = vmul.f32 %v1446_v41, %v290_v46  ;;  %v350_v48 = vmul.f32 %v1448_v42, %v290_v46  ;;  %v349_v49 = vmul.f32 %v1450_v43, %v290_v46  ;;  %v351_v50 = vmul.f32 %v1452_v44, %v290_v46 }
  0x93   : > { %v429_v53 = vadd.f32 %v391_v45, %v349_v49  ;;  %v431_v54 = vadd.f32 %v391_v45, %v351_v50  ;;  %v428_v55 = vadd.f32 %v391_v45, %v348_v47  ;;  %v430_v59 = vadd.f32 %v391_v45, %v350_v48 }
  0x94   : > { %v396_v51 = vpop.permute.xlu1 %395  ;;  %v295_v52 = vpop.permute.xlu0 %294 }
  0x95   : > { %v352_v56 = vmul.f32 %v1446_v41, %v295_v52  ;;  %v354_v57 = vmul.f32 %v1448_v42, %v295_v52  ;;  %v353_v58 = vmul.f32 %v1450_v43, %v295_v52  ;;  %v355_v60 = vmul.f32 %v1452_v44, %v295_v52 }
  0x96   : > { %v461_v3 = vmax.f32 %v429_v53, 0.0  ;;  %v463_v4 = vmax.f32 %v431_v54, 0.0  ;;  %v460_v5 = vmax.f32 %v428_v55, 0.0  ;;  %v462_v6 = vmax.f32 %v430_v59, 0.0 }
  0x97   : > { %v433_v61 = vadd.f32 %v396_v51, %v353_v58  ;;  %v432_v62 = vadd.f32 %v396_v51, %v352_v56  ;;  %v434_v63 = vadd.f32 %v396_v51, %v354_v57  ;;  %v435_v2 = vadd.f32 %v396_v51, %v355_v60 }
  0x98   : > { %v305_v0 = vpop.permute.xlu1 %304  ;;  %v300_v1 = vpop.permute.xlu0 %299 }
  0x99   : > { %v360_v7 = vmul.f32 %v1446_v41, %v305_v0  ;;  %v361_v8 = vmul.f32 %v1450_v43, %v305_v0  ;;  %v362_v9 = vmul.f32 %v1448_v42, %v305_v0  ;;  %v363_v10 = vmul.f32 %v1452_v44, %v305_v0 }
  0x9a   : > { %v465_v11 = vmax.f32 %v433_v61, 0.0  ;;  %v467_v12 = vmax.f32 %v435_v2, 0.0  ;;  %v464_v13 = vmax.f32 %v432_v62, 0.0  ;;  %v466_v14 = vmax.f32 %v434_v63, 0.0 }
  0x9b   : > { %v356_v15 = vmul.f32 %v1446_v41, %v300_v1  ;;  %v357_v16 = vmul.f32 %v1450_v43, %v300_v1  ;;  %v358_v17 = vmul.f32 %v1448_v42, %v300_v1  ;;  %v359_v18 = vmul.f32 %v1452_v44, %v300_v1 }
  0x9c   : > { %v406_v19 = vpop.permute.xlu1 %405  ;;  %v401_v20 = vpop.permute.xlu0 %400  ;;  %v1102_v30 = vpack.c.bf16 %v465_v11, %v461_v3  ;;  %v1118_v31 = vpack.c.bf16 %v467_v12, %v463_v4  ;;  %v1104_v32 = vpack.c.bf16 %v464_v13, %v460_v5  ;;  %v1120_v33 = vpack.c.bf16 %v466_v14, %v462_v6 }
  0x9d   : > { %v440_v21 = vadd.f32 %v406_v19, %v360_v7  ;;  %v441_v22 = vadd.f32 %v406_v19, %v361_v8  ;;  %v442_v24 = vadd.f32 %v406_v19, %v362_v9  ;;  %v443_v25 = vadd.f32 %v406_v19, %v363_v10 }
  0x9e   : > { %v436_v26 = vadd.f32 %v401_v20, %v356_v15  ;;  %v437_v27 = vadd.f32 %v401_v20, %v357_v16  ;;  %v438_v28 = vadd.f32 %v401_v20, %v358_v17  ;;  %v439_v29 = vadd.f32 %v401_v20, %v359_v18  ;;  %1103 = vmatprep.subr.bf16.mxu0 %v1102_v30 }
  0x9f   : > { %v473_v39 = vmax.f32 %v441_v22, 0.0  ;;  %v475_v45 = vmax.f32 %v443_v25, 0.0  ;;  %1119 = vmatprep.subr.bf16.mxu1 %v1118_v31  ;;  %1105 = vmatpush1.bf16.msra.mxu0 %v1104_v32  ;;  %v472_v52 = vmax.f32 %v440_v21, 0.0  ;;  %v474_v62 = vmax.f32 %v442_v24, 0.0 }
  0xa0   : > { %v315_v36 = vpop.permute.xlu1 %314  ;;  %v310_v37 = vpop.permute.xlu0 %309  ;;  %v469_v38 = vmax.f32 %v437_v27, 0.0  ;;  %v471_v40 = vmax.f32 %v439_v29, 0.0  ;;  %v468_v48 = vmax.f32 %v436_v26, 0.0  ;;  %1121 = vmatpush1.bf16.msra.mxu1 %v1120_v33  ;;  %v470_v61 = vmax.f32 %v438_v28, 0.0 }
  0xa1   : > { %v368_v46 = vmul.f32 %v1446_v41, %v315_v36  ;;  %v369_v47 = vmul.f32 %v1450_v43, %v315_v36  ;;  %v370_v49 = vmul.f32 %v1448_v42, %v315_v36  ;;  %v371_v50 = vmul.f32 %v1452_v44, %v315_v36 }
  0xa2   : > { %v364_v51 = vmul.f32 %v1446_v41, %v310_v37  ;;  %v365_v53 = vmul.f32 %v1450_v43, %v310_v37  ;;  %v366_v54 = vmul.f32 %v1448_v42, %v310_v37  ;;  %v1106_v55 = vpack.c.bf16 %v473_v39, %v469_v38 }
  0xa3   : > { %v1122_v56 = vpack.c.bf16 %v475_v45, %v471_v40  ;;  %v367_v57 = vmul.f32 %v1452_v44, %v310_v37  ;;  %v1108_v60 = vpack.c.bf16 %v472_v52, %v468_v48  ;;  %v1124_v7 = vpack.c.bf16 %v474_v62, %v470_v61  ;;  %v498_v61 = vld [vmem:[%s1616_s3 + $0x30] sm:$0xff]  ;;  %v499_v62 = vld [vmem:[%s1616_s3 + $0x38] sm:$0xff] }
  0xa4   : > { %v416_v58 = vpop.permute.xlu1 %415  ;;  %v411_v59 = vpop.permute.xlu0 %410  ;;  %1107 = vmatprep.subr.bf16.mxu0 %v1106_v55  ;;  %v492_v55 = vld [vmem:[%s1616_s3] sm:$0xff] }
  0xa5   : > { %1123 = vmatprep.subr.bf16.mxu1 %v1122_v56  ;;  %v448_v63 = vadd.f32 %v416_v58, %v368_v46  ;;  %v449_v0 = vadd.f32 %v416_v58, %v369_v47  ;;  %v450_v1 = vadd.f32 %v416_v58, %v370_v49  ;;  %v451_v2 = vadd.f32 %v416_v58, %v371_v50  ;;  %v493_v56 = vld [vmem:[%s1616_s3 + $0x8] sm:$0xff]  ;;  %v495_v58 = vld [vmem:[%s1616_s3 + $0x18] sm:$0xff] }
  0xa6   : > { %v444_v3 = vadd.f32 %v411_v59, %v364_v51  ;;  %v445_v4 = vadd.f32 %v411_v59, %v365_v53  ;;  %v446_v5 = vadd.f32 %v411_v59, %v366_v54  ;;  %1109 = vmatpush1.bf16.msra.mxu0 %v1108_v60  ;;  %v447_v6 = vadd.f32 %v411_v59, %v367_v57  ;;  %v494_v57 = vld [vmem:[%s1616_s3 + $0x10] sm:$0xff]  ;;  %v496_v59 = vld [vmem:[%s1616_s3 + $0x20] sm:$0xff]  ;;  %v497_v60 = vld [vmem:[%s1616_s3 + $0x28] sm:$0xff] }
  0xa7   : > { %v481_v8 = vmax.f32 %v449_v0, 0.0  ;;  %v480_v9 = vmax.f32 %v448_v63, 0.0  ;;  %1125 = vmatpush1.bf16.msra.mxu1 %v1124_v7  ;;  %v483_v14 = vmax.f32 %v451_v2, 0.0  ;;  %v482_v24 = vmax.f32 %v450_v1, 0.0 }
  0xa8   : > { %v325_v10 = vpop.permute.xlu1 %324  ;;  %v320_v11 = vpop.permute.xlu0 %319  ;;  %v477_v12 = vmax.f32 %v445_v4, 0.0  ;;  %v476_v13 = vmax.f32 %v444_v3, 0.0  ;;  %v478_v15 = vmax.f32 %v446_v5, 0.0  ;;  %v479_v21 = vmax.f32 %v447_v6, 0.0 }
  0xa9   : > { %v376_v16 = vmul.f32 %v1446_v41, %v325_v10  ;;  %v377_v17 = vmul.f32 %v1450_v43, %v325_v10  ;;  %v378_v18 = vmul.f32 %v1448_v42, %v325_v10  ;;  %v379_v19 = vmul.f32 %v1452_v44, %v325_v10 }
  0xaa   : > { %v1110_v20 = vpack.c.bf16 %v481_v8, %v477_v12  ;;  %v1112_v22 = vpack.c.bf16 %v480_v9, %v476_v13  ;;  %v372_v25 = vmul.f32 %v1446_v41, %v320_v11  ;;  %v373_v26 = vmul.f32 %v1450_v43, %v320_v11 }
  0xab   : > { %v374_v27 = vmul.f32 %v1448_v42, %v320_v11  ;;  %v375_v28 = vmul.f32 %v1452_v44, %v320_v11  ;;  %v1126_v31 = vpack.c.bf16 %v483_v14, %v479_v21  ;;  %v1128_v45 = vpack.c.bf16 %v482_v24, %v478_v15 }
  0xac   : > { %v426_v29 = vpop.permute.xlu1 %425  ;;  %v421_v30 = vpop.permute.xlu0 %420  ;;  %1111 = vmatprep.subr.bf16.mxu0 %v1110_v20 }
  0xad   : > { %v456_v32 = vadd.f32 %v426_v29, %v376_v16  ;;  %v457_v33 = vadd.f32 %v426_v29, %v377_v17  ;;  %v458_v36 = vadd.f32 %v426_v29, %v378_v18  ;;  %v459_v37 = vadd.f32 %v426_v29, %v379_v19  ;;  %1113 = vmatpush1.bf16.msra.mxu0 %v1112_v22 }
  0xae   : > { %v452_v38 = vadd.f32 %v421_v30, %v372_v25  ;;  %v453_v39 = vadd.f32 %v421_v30, %v373_v26  ;;  %v454_v40 = vadd.f32 %v421_v30, %v374_v27  ;;  %1127 = vmatprep.subr.bf16.mxu1 %v1126_v31  ;;  %v455_v41 = vadd.f32 %v421_v30, %v375_v28 }
  0xaf   : > { %v489_v43 = vmax.f32 %v457_v33, 0.0  ;;  %v488_v46 = vmax.f32 %v456_v32, 0.0  ;;  %v491_v47 = vmax.f32 %v459_v37, 0.0  ;;  %1129 = vmatpush1.bf16.msra.mxu1 %v1128_v45  ;;  %v490_v50 = vmax.f32 %v458_v36, 0.0 }
  0xb0   : > { %v485_v42 = vmax.f32 %v453_v39, 0.0  ;;  %v484_v44 = vmax.f32 %v452_v38, 0.0  ;;  %v486_v48 = vmax.f32 %v454_v40, 0.0  ;;  %v487_v49 = vmax.f32 %v455_v41, 0.0  ;;  %v511_v63 = vpop.permute.xlu0 %510  ;;  %v516_v0 = vpop.permute.xlu1 %515 }
  0xb2   : > { %v1114_v51 = vpack.c.bf16 %v489_v43, %v485_v42  ;;  %v1116_v52 = vpack.c.bf16 %v488_v46, %v484_v44  ;;  %v1130_v53 = vpack.c.bf16 %v491_v47, %v487_v49  ;;  %v1132_v54 = vpack.c.bf16 %v490_v50, %v486_v48 }
  0xb4   : > { %1115 = vmatprep.subr.bf16.mxu0 %v1114_v51  ;;  %1131 = vmatprep.subr.bf16.mxu1 %v1130_v53  ;;  %v521_v1 = vpop.permute.xlu0 %520  ;;  %v1540_v2 = vpop.permute.xlu1 %525 }
  0xb5   : > { %1117 = vmatpush1.bf16.msra.mxu0 %v1116_v52  ;;  %1133 = vmatpush1.bf16.msra.mxu1 %v1132_v54 }
  0xb8   : > { %1080 = vmatmul.mubr.msk.f32.vlgmr.msra.gmra.mrb[0].mxu0 %vm548_vm0, %v492_v55  ;;  %1088 = vmatmul.mubr.msk.f32.vlgmr.msra.gmra.mrb[0].mxu1 %vm548_vm0, %v492_v55  ;;  %v842_v3 = vpop.permute.xlu0 %841  ;;  %v847_v4 = vpop.permute.xlu1 %846 }
  0xb9   : > { %643 = vmatprep.mubr.f32.mxu0 %v1243_v23  ;;  %756 = vmatprep.mubr.f32.mxu1 %v1243_v23 }
  0xbc   : > { %1081 = vmatmul.mubr.msk.f32.gmra.mrb[2].mxu0 %vm548_vm0, %v493_v56  ;;  %1089 = vmatmul.mubr.msk.f32.gmra.mrb[2].mxu1 %vm548_vm0, %v493_v56  ;;  %v1542_v13 = vpop.permute.xlu0 %530  ;;  %v852_v21 = vpop.permute.xlu1 %851 }
  0xbd   : > { %649 = vmatprep.mubr.f32.mxu0 %v1243_v23  ;;  %762 = vmatprep.mubr.f32.mxu1 %v1243_v23 }
  0xc0   : > { %1082 = vmatmul.mubr.msk.f32.gmra.mrb[4].mxu0 %vm548_vm0, %v494_v57  ;;  %1090 = vmatmul.mubr.msk.f32.gmra.mrb[4].mxu1 %vm548_vm0, %v494_v57  ;;  %v1544_v45 = vpop.permute.xlu0 %535  ;;  %v857_v52 = vpop.permute.xlu1 %856 }
  0xc1   : > { %655 = vmatprep.mubr.f32.mxu0 %v1243_v23  ;;  %768 = vmatprep.mubr.f32.mxu1 %v1243_v23 }
  0xc4   : > { %1083 = vmatmul.mubr.msk.f32.gmra.mrb[6].mxu0 %vm548_vm0, %v495_v58  ;;  %1091 = vmatmul.mubr.msk.f32.gmra.mrb[6].mxu1 %vm548_vm0, %v495_v58 }
  0xc5   : > { %661 = vmatprep.mubr.f32.mxu0 %v1243_v23  ;;  %774 = vmatprep.mubr.f32.mxu1 %v1243_v23 }
  0xc8   : > { %1084 = vmatmul.mubr.msk.f32.gmra.mrb[8].mxu0 %vm548_vm0, %v496_v59  ;;  %1092 = vmatmul.mubr.msk.f32.gmra.mrb[8].mxu1 %vm548_vm0, %v496_v59 }
  0xc9   : > { %667 = vmatprep.mubr.f32.mxu0 %v1243_v23  ;;  %780 = vmatprep.mubr.f32.mxu1 %v1243_v23 }
  0xcc   : > { %1085 = vmatmul.mubr.msk.f32.gmra.mrb[10].mxu0 %vm548_vm0, %v497_v60  ;;  %1093 = vmatmul.mubr.msk.f32.gmra.mrb[10].mxu1 %vm548_vm0, %v497_v60 }
  0xcd   : > { %673 = vmatprep.mubr.f32.mxu0 %v1243_v23  ;;  %786 = vmatprep.mubr.f32.mxu1 %v1243_v23 }
  0xd0   : > { %1086 = vmatmul.mubr.msk.f32.gmra.mrb[12].mxu0 %vm548_vm0, %v498_v61  ;;  %1094 = vmatmul.mubr.msk.f32.gmra.mrb[12].mxu1 %vm548_vm0, %v498_v61 }
  0xd1   : > { %679 = vmatprep.mubr.f32.mxu0 %v1243_v23  ;;  %792 = vmatprep.mubr.f32.mxu1 %v1243_v23 }
  0xd4   : > { %1087 = vmatmul.mubr.msk.f32.gmra.mrb[14].mxu0 %vm548_vm0, %v499_v62  ;;  %1095 = vmatmul.mubr.msk.f32.gmra.mrb[14].mxu1 %vm548_vm0, %v499_v62 }
 0x18b   : > { %v639_v5 = vpop.f32.mrb[0].mxu0  ;;  %v752_v7 = vpop.f32.mrb[0].mxu1 }
 0x18c   : > { %v640_v6 = vadd.f32 %v639_v5, %v511_v63  ;;  %v641_v8 = vpop.f32.mrb[1].mxu0  ;;  %v753_v9 = vadd.f32 %v752_v7, %v511_v63  ;;  %v754_v11 = vpop.f32.mrb[1].mxu1 }
 0x18d   : > { %v642_v10 = vadd.f32 %v641_v8, %v511_v63  ;;  %v755_v23 = vadd.f32 %v754_v11, %v511_v63 }
 0x18e   : > { %v799_v12 = vmax.f32 %v640_v6, 0.0  ;;  %v801_v14 = vmax.f32 %v753_v9, 0.0 }
 0x18f   : > { %v800_v15 = vmax.f32 %v642_v10, 0.0  ;;  %v645_v16 = vpop.f32.mrb[2].mxu0  ;;  %v802_v17 = vmax.f32 %v755_v23, 0.0  ;;  %v758_v19 = vpop.f32.mrb[2].mxu1 }
 0x190   : > { %v646_v18 = vadd.f32 %v645_v16, %v516_v0  ;;  %v647_v20 = vpop.f32.mrb[3].mxu0  ;;  %v759_v22 = vadd.f32 %v758_v19, %v516_v0  ;;  %v760_v25 = vpop.f32.mrb[3].mxu1  ;;  %v879_v26 = vmul.f32 %v842_v3, %v799_v12  ;;  %v881_v29 = vmul.f32 %v842_v3, %v801_v14 }
 0x191   : > { %v648_v24 = vadd.f32 %v647_v20, %v516_v0  ;;  %v761_v28 = vadd.f32 %v760_v25, %v516_v0  ;;  %v880_v30 = vmul.f32 %v842_v3, %v800_v15  ;;  %v882_v36 = vmul.f32 %v842_v3, %v802_v17  ;;  %v1550_v10 = vpop.permute.xlu0 %540 }
 0x192   : > { %v803_v27 = vmax.f32 %v646_v18, 0.0  ;;  %v805_v31 = vmax.f32 %v759_v22, 0.0 }
 0x193   : > { %v804_v32 = vmax.f32 %v648_v24, 0.0  ;;  %v651_v33 = vpop.f32.mrb[4].mxu0  ;;  %v806_v38 = vmax.f32 %v761_v28, 0.0  ;;  %v764_v40 = vpop.f32.mrb[4].mxu1 }
 0x194   : > { %v883_v37 = vmul.f32 %v847_v4, %v803_v27  ;;  %v652_v39 = vadd.f32 %v651_v33, %v521_v1  ;;  %v653_v41 = vpop.f32.mrb[5].mxu0  ;;  %v885_v43 = vmul.f32 %v847_v4, %v805_v31  ;;  %v765_v42 = vadd.f32 %v764_v40, %v521_v1  ;;  %v766_v44 = vpop.f32.mrb[5].mxu1 }
 0x195   : > { %v884_v46 = vmul.f32 %v847_v4, %v804_v32  ;;  %v654_v47 = vadd.f32 %v653_v41, %v521_v1  ;;  %v886_v49 = vmul.f32 %v847_v4, %v806_v38  ;;  %v767_v51 = vadd.f32 %v766_v44, %v521_v1  ;;  %v862_v24 = vpop.permute.xlu1 %861 }
 0x196   : > { %v911_v48 = vadd.f32 %v883_v37, %v879_v26  ;;  %v807_v50 = vmax.f32 %v652_v39, 0.0  ;;  %v937_v53 = vadd.f32 %v885_v43, %v881_v29  ;;  %v809_v55 = vmax.f32 %v765_v42, 0.0 }
 0x197   : > { %v924_v54 = vadd.f32 %v884_v46, %v880_v30  ;;  %v808_v56 = vmax.f32 %v654_v47, 0.0  ;;  %v657_v57 = vpop.f32.mrb[6].mxu0  ;;  %v950_v58 = vadd.f32 %v886_v49, %v882_v36  ;;  %v810_v60 = vmax.f32 %v767_v51, 0.0  ;;  %v770_v62 = vpop.f32.mrb[6].mxu1 }
 0x198   : > { %v887_v59 = vmul.f32 %v852_v21, %v807_v50  ;;  %v658_v61 = vadd.f32 %v657_v57, %v1540_v2  ;;  %v659_v63 = vpop.f32.mrb[7].mxu0  ;;  %v889_v0 = vmul.f32 %v852_v21, %v809_v55  ;;  %v771_v5 = vadd.f32 %v770_v62, %v1540_v2  ;;  %v772_v1 = vpop.f32.mrb[7].mxu1 }
 0x199   : > { %v888_v3 = vmul.f32 %v852_v21, %v808_v56  ;;  %v660_v4 = vadd.f32 %v659_v63, %v1540_v2  ;;  %v890_v7 = vmul.f32 %v852_v21, %v810_v60  ;;  %v773_v9 = vadd.f32 %v772_v1, %v1540_v2  ;;  %v546_v47 = vpop.permute.xlu0 %545  ;;  %v867_v55 = vpop.permute.xlu1 %866 }
 0x19a   : > { %v912_v6 = vadd.f32 %v911_v48, %v887_v59  ;;  %v811_v8 = vmax.f32 %v658_v61, 0.0  ;;  %v938_v11 = vadd.f32 %v937_v53, %v889_v0  ;;  %v813_v23 = vmax.f32 %v771_v5, 0.0 }
 0x19b   : > { %v925_v12 = vadd.f32 %v924_v54, %v888_v3  ;;  %v812_v14 = vmax.f32 %v660_v4, 0.0  ;;  %v663_v15 = vpop.f32.mrb[8].mxu0  ;;  %v951_v16 = vadd.f32 %v950_v58, %v890_v7  ;;  %v814_v18 = vmax.f32 %v773_v9, 0.0  ;;  %v776_v20 = vpop.f32.mrb[8].mxu1 }
 0x19c   : > { %v891_v17 = vmul.f32 %v857_v52, %v811_v8  ;;  %v664_v19 = vadd.f32 %v663_v15, %v1542_v13  ;;  %v665_v22 = vpop.f32.mrb[9].mxu0  ;;  %v893_v25 = vmul.f32 %v857_v52, %v813_v23  ;;  %v777_v26 = vadd.f32 %v776_v20, %v1542_v13  ;;  %v778_v27 = vpop.f32.mrb[9].mxu1 }
 0x19d   : > { %v892_v21 = vmul.f32 %v857_v52, %v812_v14  ;;  %v666_v2 = vadd.f32 %v665_v22, %v1542_v13  ;;  %v894_v29 = vmul.f32 %v857_v52, %v814_v18  ;;  %v779_v31 = vadd.f32 %v778_v27, %v1542_v13  ;;  %v872_v23 = vpop.permute.xlu0 %871 }
 0x19e   : > { %v913_v28 = vadd.f32 %v912_v6, %v891_v17  ;;  %v815_v30 = vmax.f32 %v664_v19, 0.0  ;;  %v939_v32 = vadd.f32 %v938_v11, %v893_v25  ;;  %v817_v36 = vmax.f32 %v777_v26, 0.0 }
 0x19f   : > { %v926_v33 = vadd.f32 %v925_v12, %v892_v21  ;;  %v816_v37 = vmax.f32 %v666_v2, 0.0  ;;  %v669_v38 = vpop.f32.mrb[10].mxu0  ;;  %v952_v39 = vadd.f32 %v951_v16, %v894_v29  ;;  %v818_v41 = vmax.f32 %v779_v31, 0.0  ;;  %v782_v46 = vpop.f32.mrb[10].mxu1 }
 0x1a0   : > { %v895_v40 = vmul.f32 %v862_v24, %v815_v30  ;;  %v670_v43 = vadd.f32 %v669_v38, %v1544_v45  ;;  %v671_v42 = vpop.f32.mrb[11].mxu0  ;;  %v897_v44 = vmul.f32 %v862_v24, %v817_v36  ;;  %v783_v49 = vadd.f32 %v782_v46, %v1544_v45  ;;  %v784_v13 = vpop.f32.mrb[11].mxu1 }
 0x1a1   : > { %v896_v48 = vmul.f32 %v862_v24, %v816_v37  ;;  %v672_v50 = vadd.f32 %v671_v42, %v1544_v45  ;;  %v898_v52 = vmul.f32 %v862_v24, %v818_v41  ;;  %v785_v54 = vadd.f32 %v784_v13, %v1544_v45 }
 0x1a2   : > { %v914_v51 = vadd.f32 %v913_v28, %v895_v40  ;;  %v819_v53 = vmax.f32 %v670_v43, 0.0  ;;  %v940_v56 = vadd.f32 %v939_v32, %v897_v44  ;;  %v821_v58 = vmax.f32 %v783_v49, 0.0 }
 0x1a3   : > { %v927_v57 = vadd.f32 %v926_v33, %v896_v48  ;;  %v820_v59 = vmax.f32 %v672_v50, 0.0  ;;  %v675_v60 = vpop.f32.mrb[12].mxu0  ;;  %v953_v61 = vadd.f32 %v952_v39, %v898_v52  ;;  %v822_v63 = vmax.f32 %v785_v54, 0.0  ;;  %v788_v3 = vpop.f32.mrb[12].mxu1 }
 0x1a4   : > { %v899_v62 = vmul.f32 %v867_v55, %v819_v53  ;;  %v676_v0 = vadd.f32 %v675_v60, %v1550_v10  ;;  %v677_v5 = vpop.f32.mrb[13].mxu0  ;;  %v901_v4 = vmul.f32 %v867_v55, %v821_v58  ;;  %v789_v6 = vadd.f32 %v788_v3, %v1550_v10  ;;  %v790_v45 = vpop.f32.mrb[13].mxu1 }
 0x1a5   : > { %v900_v1 = vmul.f32 %v867_v55, %v820_v59  ;;  %v678_v7 = vadd.f32 %v677_v5, %v1550_v10  ;;  %v902_v9 = vmul.f32 %v867_v55, %v822_v63  ;;  %v791_v12 = vadd.f32 %v790_v45, %v1550_v10  ;;  %v877_v33 = vpop.permute.xlu1 %876 }
 0x1a6   : > { %v915_v8 = vadd.f32 %v914_v51, %v899_v62  ;;  %v823_v11 = vmax.f32 %v676_v0, 0.0  ;;  %v941_v14 = vadd.f32 %v940_v56, %v901_v4  ;;  %v825_v16 = vmax.f32 %v789_v6, 0.0 }
 0x1a7   : > { %v928_v15 = vadd.f32 %v927_v57, %v900_v1  ;;  %v824_v17 = vmax.f32 %v678_v7, 0.0  ;;  %v681_v18 = vpop.f32.mrb[14].mxu0  ;;  %v954_v19 = vadd.f32 %v953_v61, %v902_v9  ;;  %v826_v22 = vmax.f32 %v791_v12, 0.0  ;;  %v794_v25 = vpop.f32.mrb[14].mxu1 }
 0x1a8   : > { %v903_v20 = vmul.f32 %v872_v23, %v823_v11  ;;  %v682_v24 = vadd.f32 %v681_v18, %v546_v47  ;;  %v683_v21 = vpop.f32.mrb[15].mxu0  ;;  %v905_v26 = vmul.f32 %v872_v23, %v825_v16  ;;  %v795_v27 = vadd.f32 %v794_v25, %v546_v47  ;;  %v796_v29 = vpop.f32.mrb[15].mxu1 }
 0x1a9   : > { %v904_v2 = vmul.f32 %v872_v23, %v824_v17  ;;  %v684_v28 = vadd.f32 %v683_v21, %v546_v47  ;;  %v906_v31 = vmul.f32 %v872_v23, %v826_v22  ;;  %v797_v32 = vadd.f32 %v796_v29, %v546_v47 }
 0x1aa   : > { %v916_v30 = vadd.f32 %v915_v8, %v903_v20  ;;  %v827_v10 = vmax.f32 %v682_v24, 0.0  ;;  %v942_v36 = vadd.f32 %v941_v14, %v905_v26  ;;  %v829_v38 = vmax.f32 %v795_v27, 0.0 }
 0x1ab   : > { %v929_v37 = vadd.f32 %v928_v15, %v904_v2  ;;  %v828_v39 = vmax.f32 %v684_v28, 0.0  ;;  %v955_v40 = vadd.f32 %v954_v19, %v906_v31  ;;  %v830_v43 = vmax.f32 %v797_v32, 0.0 }
 0x1ac   : > { %v907_v41 = vmul.f32 %v877_v33, %v827_v10  ;;  %v909_v46 = vmul.f32 %v877_v33, %v829_v38  ;;  %v1244_v61 = vmov 1966171168   ;;  %v964_v6 = vstv %s963_s23 }
 0x1ad   : > { %v908_v42 = vmul.f32 %v877_v33, %v828_v39  ;;  %v910_v48 = vmul.f32 %v877_v33, %v830_v43  ;;  %v976_v62 = vunpack.c.l.s4 %v1244_v61 }
 0x1ae   : > { %v917_v44 = vadd.f32 %v916_v30, %v907_v41  ;;  %v943_v49 = vadd.f32 %v942_v36, %v909_v46 }
 0x1af   : > { %v930_v50 = vadd.f32 %v929_v37, %v908_v42  ;;  %v956_v51 = vadd.f32 %v955_v40, %v910_v48  ;;  %v977_v8 = vunpack.c.0.s8 %v976_v62 }
 0x1b0   : > { %v918_v13 = vrot.slane %v917_v44, 4  ;;  %v944_v52 = vrot.slane %v943_v49, 4 }
 0x1b1   : > { %v931_v53 = vrot.slane %v930_v50, 4  ;;  %v957_v54 = vrot.slane %v956_v51, 4  ;;  %v980_v18 = vsub.s32 %v977_v8, %v1437_v35 }
 0x1b2   : > { %v919_v47 = vadd.f32 %v918_v13, %v917_v44  ;;  %v945_v55 = vadd.f32 %v944_v52, %v943_v49 }
 0x1b3   : > { %v932_v56 = vadd.f32 %v931_v53, %v930_v50  ;;  %v958_v58 = vadd.f32 %v957_v54, %v956_v51 }
 0x1b4   : > { %v920_v57 = vrot.slane %v919_v47, 2  ;;  %v946_v59 = vrot.slane %v945_v55, 2 }
 0x1b5   : > { %v933_v60 = vrot.slane %v932_v56, 2  ;;  %v959_v0 = vrot.slane %v958_v58, 2 }
 0x1b6   : > { %v921_v63 = vadd.f32 %v920_v57, %v919_v47  ;;  %v947_v3 = vadd.f32 %v946_v59, %v945_v55 }
 0x1b7   : > { %v934_v5 = vadd.f32 %v933_v60, %v932_v56  ;;  %v960_v1 = vadd.f32 %v959_v0, %v958_v58 }
 0x1b8   : > { %v922_v4 = vrot.slane %v921_v63, 1  ;;  %v948_v7 = vrot.slane %v947_v3, 1 }
 0x1b9   : > { %v935_v45 = vrot.slane %v934_v5, 1  ;;  %v961_v11 = vrot.slane %v960_v1, 1 }
 0x1ba   : > { %v923_v9 = vadd.f32 %v922_v4, %v921_v63  ;;  %v949_v12 = vadd.f32 %v948_v7, %v947_v3 }
 0x1bb   : > { %v936_v23 = vadd.f32 %v935_v45, %v934_v5  ;;  %v962_v15 = vadd.f32 %v961_v11, %v960_v1 }
 0x1bc   : > { %v965_v14 = vadd.f32 %v964_v6, %v923_v9  ;;  %v967_v16 = vadd.f32 %v964_v6, %v949_v12 }
 0x1bd   : > { %v966_v17 = vadd.f32 %v964_v6, %v936_v23  ;;  %v968_v19 = vadd.f32 %v964_v6, %v962_v15 }
 0x1bf   : > { %v973_v20 = vcombine.low %v965_v14, %v966_v17  ;;  %v974_v22 = vcombine.low %v967_v16, %v968_v19 }
 0x1c1   : > { %v981_v24 = vrot.slane %v973_v20, %v980_v18  ;;  %v988_v25 = vrot.slane %v974_v22, %v980_v18 }
 0x1c3   : > { %v989_v21 = vcombine.low %v981_v24, %v988_v25 }
 0x1c5   : > { %v996_v26 = vrot.slane %v989_v21, %v980_v18 }
 0x1c7   : > { %1002 = vst.msk [vmem:[%s271_s9] sm:$0xf] %vm1000_vm1, %v996_v26 }
 0x1c8   : > { %1191 = shalt.err (!%p1188_p3)
}
 0x1c9   : > { %s1192_s21 = scalar_lea.hbm %s1571_s16, 64  ;;  %s1196_s24 = scalar_lea.hbm %s1620_s7, 128 }
 0x1ca   : > { %p1193_p4 = scmp.ne.s32.totalorder %s1571_s16, %s1192_s21  ;;  %p1197_p9 = scmp.lt.u32.totalorder %s1571_s16, %s1620_s7 }
 0x1cb   : > { %p1198_p10 = scmp.lt.u32.totalorder %s1196_s24, %s1192_s21  ;;  %p1200_p12 = scmp.lt.u32.totalorder %s1192_s21, %s1571_s16 }
 0x1cc   : > { %p1194_p7 = pnand %p1193_p4, %p1327_p5 }
 0x1cd   : > { %p1199_p11 = por %p1198_p10, %p1197_p9 }
 0x1ce   : > { %p1195_p8 = pneg %p1194_p7 }
 0x1cf   : > { %p1201_p13 = por %p1200_p12, %p1199_p11 }
 0x1d1   : > { %p1202_p0 = pnand %p1201_p13, %p1195_p8 }
 0x1d3   : > { %1205 = shalt.err (!%p1202_p0)
}
 0x1d4   : > { %1134 = dma.vmem_to_hbm [thread:$0]  (%p1327_p5), %s1573_s10, 64, %s1571_s16, %s1004_s17  }
 0x1d5 PF: > { %p1140_p1 = scmp.ge.s32.totalorder %s1240_s29, 2  ;;  %s1030_s9 = sand.u32 1, %s1228_s26  }
 0x1d6   : > { %s1031_s14 = scalar_lea.sflag [#allocation4], %s1030_s9 }
 0x1d7   : > { %p1137_p2 = pnand %p1140_p1, %p1331_p6 }
 0x1d9   : > { %1223 = dma.done.wait (!%p1137_p2), %s1031_s14, 64  }
 0x1da   : > { %1225 = vsyncadd (!%p1137_p2), %s1031_s14, 4294967232  ;;  %p18_p3 = scmp.ge.s32.totalorder %s1314_s8, 4   ;;  %s1623_s26 = smov %s1232_s27 }
 0x1db   : > { %s1624_s27 = smov %s1236_s28  ;;  %s1625_s28 = smov %s1325_s11 }
 0x1dc   : > { %s1626_s29 = smov %s1314_s8  ;;  %20 = sbr.rel (!%p18_p3) target bundleno = 5 (0x5), region = 83 }
 0x1e3   :  { %1036 = vsyncpa [#allocation4], 1 }
 0x1e4   :  { %1038 = vsyncpa [#allocation4 + $0x1], 1 }

</bundles_post_ra>
